<compile_context>
chip_gen: v7x
topology: tpu7x:2x2x1
jax: 0.10.0
libtpu: 0.0.40
codegen_flags: <defaults>
</compile_context>

<pallas_src>
import functools

import jax
import jax.numpy as jnp
from jax.experimental import pallas as pl
from jax.experimental.pallas import tpu as pltpu

_LANE_PAD = 128     # pad every feature dim to one full lane width
_NUM_LAYERS = 5

_VMEM = pl.BlockSpec(memory_space=pltpu.MemorySpace.VMEM)


# ----------------------------- kernels ---------------------------------------


def _mlp(x_f32, w_ref, b_ref):
    """4x (matmul + bias + ReLU) then final matmul + bias, on 128-lane padded features."""
    h = x_f32.astype(jnp.bfloat16)
    for i in range(_NUM_LAYERS - 1):
        acc = jnp.dot(h, w_ref[i], preferred_element_type=jnp.float32) + b_ref[i]
        h = jnp.maximum(acc, 0.0).astype(jnp.bfloat16)
    return jnp.dot(h, w_ref[_NUM_LAYERS - 1],
                   preferred_element_type=jnp.float32) + b_ref[_NUM_LAYERS - 1]


def _pokenet_kernel(x_ref, w_ref, b_ref, out_ref):
    """Single-network fused forward (3 input DMAs: x, weight slab, bias slab)."""
    out_ref[...] = _mlp(x_ref[...], w_ref, b_ref).astype(out_ref.dtype)


def _pokenet_both_kernel(x_ref, w_on_ref, b_on_ref, w_tg_ref, b_tg_ref,
                         out_on_ref, out_tg_ref):
    """One launch computing both 'online' and 'target' forwards on the same batch."""
    x = x_ref[...]
    out_on_ref[...] = _mlp(x, w_on_ref, b_on_ref).astype(out_on_ref.dtype)
    out_tg_ref[...] = _mlp(x, w_tg_ref, b_tg_ref).astype(out_tg_ref.dtype)


# ----------------------------- wrappers ---------------------------------------


def _pad_batch(x):
    """Pad activations to (ceil(B/8)*8, 128) f32 so the kernel sees lane/sublane-aligned tiles."""
    batch, n_in = x.shape
    bpad = ((batch + 7) // 8) * 8
    xp = jnp.zeros((bpad, _LANE_PAD), jnp.float32).at[:batch, :n_in].set(x)
    return xp, bpad


@functools.partial(jax.jit, static_argnames=("n_outputs",))
def pokenet_forward(x, w_slab, b_slab, *, n_outputs):
    """Forward one network: x (B, n_in) f32, w_slab (5,128,128) bf16, b_slab (5,1,128) f32."""
    batch = x.shape[0]
    xp, bpad = _pad_batch(x)
    out = pl.pallas_call(
        _pokenet_kernel,
        out_shape=jax.ShapeDtypeStruct((bpad, _LANE_PAD), jnp.float32),
        in_specs=[_VMEM, _VMEM, _VMEM],
        out_specs=_VMEM,
    )(xp, w_slab, b_slab)
    return out[:batch, :n_outputs]


@functools.partial(jax.jit, static_argnames=("n_outputs",))
def pokenet_forward_both(x, w_on, b_on, w_tg, b_tg, *, n_outputs):
    """Fused single-launch forward of both 'online' and 'target' networks."""
    batch = x.shape[0]
    xp, bpad = _pad_batch(x)
    out_on, out_tg = pl.pallas_call(
        _pokenet_both_kernel,
        out_shape=(jax.ShapeDtypeStruct((bpad, _LANE_PAD), jnp.float32),
                   jax.ShapeDtypeStruct((bpad, _LANE_PAD), jnp.float32)),
        in_specs=[_VMEM] * 5,
        out_specs=(_VMEM, _VMEM),
    )(xp, w_on, b_on, w_tg, b_tg)
    return out_on[:batch, :n_outputs], out_tg[:batch, :n_outputs]


# ----------------------------- params -----------------------------------------


def init_pokenet_params(key, n_inputs, n_outputs, hidden_dim):
    """Deterministic init mimicking nn.Linear; stored as (in, out) weights + (1, out) biases."""
    dims = [n_inputs] + [hidden_dim] * 4 + [n_outputs]
    params = []
    for i in range(_NUM_LAYERS):
        key, wk, bk = jax.random.split(key, 3)
        bound = 1.0 / float(dims[i]) ** 0.5
        w = jax.random.uniform(wk, (dims[i], dims[i + 1]), jnp.float32, -bound, bound)
        b = jax.random.uniform(bk, (1, dims[i + 1]), jnp.float32, -bound, bound)
        params.extend([w, b])
    return tuple(params)


def pack_params(params):
    """Pack (w1,b1,...,w5,b5) into one bf16 weight slab + one f32 bias slab (zero padded)."""
    w_slab = jnp.zeros((_NUM_LAYERS, _LANE_PAD, _LANE_PAD), jnp.bfloat16)
    b_slab = jnp.zeros((_NUM_LAYERS, 1, _LANE_PAD), jnp.float32)
    for i in range(_NUM_LAYERS):
        w = params[2 * i]
        b = params[2 * i + 1]
        w_slab = w_slab.at[i, :w.shape[0], :w.shape[1]].set(w.astype(jnp.bfloat16))
        b_slab = b_slab.at[i, :, :b.shape[1]].set(b)
    return w_slab, b_slab


class PokenetPallas:
    """Pallas analogue of Pokenet: `target` is a deep copy of `online` at init time."""

    def __init__(self, n_inputs, n_outputs, hidden_dim, key):
        self.n_outputs = n_outputs
        self.online_params = init_pokenet_params(key, n_inputs, n_outputs, hidden_dim)
        self.w_online, self.b_online = pack_params(self.online_params)
        # copy.deepcopy(self.online): target starts identical to online (frozen).
        # TODO(synk): requires_grad=False has no forward-pass equivalent; training-only concern.
        self.w_target = jnp.array(self.w_online)
        self.b_target = jnp.array(self.b_online)

    def __call__(self, x, model):
        if model == 'online':
            return pokenet_forward(x, self.w_online, self.b_online,
                                   n_outputs=self.n_outputs)
        if model == 'target':
            return pokenet_forward(x, self.w_target, self.b_target,
                                   n_outputs=self.n_outputs)
        raise ValueError(f"unknown model: {model}")

    def forward_both(self, x):
        """Single launch producing (online_q, target_q) for DQN TD-target computation."""
        return pokenet_forward_both(x, self.w_online, self.b_online,
                                    self.w_target, self.b_target,
                                    n_outputs=self.n_outputs)


# ----------------------------- references -------------------------------------


def _reference_forward_f32(x, params):
    """Pure-JAX f32 reference matching the original PyTorch module exactly."""
    h = x
    for i in range(4):
        h = jnp.maximum(h @ params[2 * i] + params[2 * i + 1], 0.0)
    return h @ params[8] + params[9]


def _reference_forward_packed(x, w_slab, b_slab, n_outputs):
    """Pure-JAX reference mirroring the kernel's bf16-weight / f32-accum math."""
    xp, _ = _pad_batch(x)
    h = xp.astype(jnp.bfloat16)
    for i in range(_NUM_LAYERS - 1):
        acc = jnp.dot(h, w_slab[i], preferred_element_type=jnp.float32) + b_slab[i]
        h = jnp.maximum(acc, 0.0).astype(jnp.bfloat16)
    out = jnp.dot(h, w_slab[_NUM_LAYERS - 1],
                  preferred_element_type=jnp.float32) + b_slab[_NUM_LAYERS - 1]
    return out[:x.shape[0], :n_outputs]


if __name__ == "__main__":
    key = jax.random.PRNGKey(0)
    k_param, k_x = jax.random.split(key)

    batch = 8
    n_inputs = 32
    hidden_dim = 64
    n_outputs = 16

    net = PokenetPallas(n_inputs, n_outputs, hidden_dim, k_param)
    x = jax.random.normal(k_x, (batch, n_inputs), jnp.float32)

    out_online = net(x, 'online')
    out_target = net(x, 'target')
    out_both_on, out_both_tg = net.forward_both(x)
    jax.block_until_ready((out_online, out_target, out_both_on, out_both_tg))

    assert out_online.shape == (batch, n_outputs)
    assert out_target.shape == (batch, n_outputs)
    assert out_both_on.shape == (batch, n_outputs)
    assert out_both_tg.shape == (batch, n_outputs)

    # Tight check against a pure-JAX reference running identical bf16-weight math.
    ref_packed = _reference_forward_packed(x, net.w_online, net.b_online, n_outputs)
    assert jnp.allclose(out_online, ref_packed, atol=2e-3, rtol=2e-3)

    # Loose check against the original f32 module semantics (bf16 weights add <~1% error).
    ref_f32 = _reference_forward_f32(x, net.online_params)
    assert jnp.allclose(out_online, ref_f32, atol=5e-2, rtol=5e-2)

    # target is a deep copy of online; the fused both-kernel matches the single calls.
    assert jnp.allclose(out_online, out_target, atol=1e-5)
    assert jnp.allclose(out_both_on, out_online, atol=1e-4)
    assert jnp.allclose(out_both_tg, out_target, atol=1e-4)

    print("KERNEL_OK")
</pallas_src>

<mosaic_0001>
module attributes {stable_mosaic.version = 11 : i64} {
  func.func @_pokenet_kernel(%arg0: memref<8x128xf32, #tpu.memory_space<vmem>>, %arg1: memref<5x128x128xbf16, #tpu.memory_space<vmem>>, %arg2: memref<5x1x128xf32, #tpu.memory_space<vmem>>, %arg3: memref<8x128xf32, #tpu.memory_space<vmem>>) attributes {dimension_semantics = [], scalar_prefetch = 0 : i64, scratch_operands = 0 : i64, tpu.core_type = #tpu.core_type<tc>} {
    %c0 = arith.constant 0 : index
    %c0_0 = arith.constant 0 : index
    %0 = vector.load %arg0[%c0, %c0_0] : memref<8x128xf32, #tpu.memory_space<vmem>>, vector<8x128xf32>
    %1 = arith.truncf %0 : vector<8x128xf32> to vector<8x128xbf16>
    %c0_1 = arith.constant 0 : index
    %c0_2 = arith.constant 0 : index
    %c0_3 = arith.constant 0 : index
    %2 = vector.load %arg1[%c0_1, %c0_2, %c0_3] : memref<5x128x128xbf16, #tpu.memory_space<vmem>>, vector<1x128x128xbf16>
    %3 = vector.shape_cast %2 : vector<1x128x128xbf16> to vector<128x128xbf16>
    %cst = arith.constant dense<0.000000e+00> : vector<8x128xf32>
    %4 = tpu.matmul %1, %3, %cst {dimension_numbers = #tpu.dot_dimension_numbers<[1], [0], [0], [1], [0, 0, 1, 1], [], []>} : vector<8x128xbf16>, vector<128x128xbf16>, vector<8x128xf32> -> vector<8x128xf32>
    %c0_4 = arith.constant 0 : index
    %c0_5 = arith.constant 0 : index
    %c0_6 = arith.constant 0 : index
    %5 = vector.load %arg2[%c0_4, %c0_5, %c0_6] : memref<5x1x128xf32, #tpu.memory_space<vmem>>, vector<1x1x128xf32>
    %6 = vector.shape_cast %5 : vector<1x1x128xf32> to vector<1x128xf32>
    %7 = vector.broadcast %6 : vector<1x128xf32> to vector<8x128xf32>
    %8 = arith.addf %4, %7 : vector<8x128xf32>
    %cst_7 = arith.constant 0.000000e+00 : f32
    %9 = vector.broadcast %cst_7 : f32 to vector<8x128xf32>
    %10 = arith.maximumf %8, %9 : vector<8x128xf32>
    %11 = arith.truncf %10 : vector<8x128xf32> to vector<8x128xbf16>
    %c1 = arith.constant 1 : index
    %c0_8 = arith.constant 0 : index
    %c0_9 = arith.constant 0 : index
    %12 = vector.load %arg1[%c1, %c0_8, %c0_9] : memref<5x128x128xbf16, #tpu.memory_space<vmem>>, vector<1x128x128xbf16>
    %13 = vector.shape_cast %12 : vector<1x128x128xbf16> to vector<128x128xbf16>
    %cst_10 = arith.constant dense<0.000000e+00> : vector<8x128xf32>
    %14 = tpu.matmul %11, %13, %cst_10 {dimension_numbers = #tpu.dot_dimension_numbers<[1], [0], [0], [1], [0, 0, 1, 1], [], []>} : vector<8x128xbf16>, vector<128x128xbf16>, vector<8x128xf32> -> vector<8x128xf32>
    %c1_11 = arith.constant 1 : index
    %c0_12 = arith.constant 0 : index
    %c0_13 = arith.constant 0 : index
    %15 = vector.load %arg2[%c1_11, %c0_12, %c0_13] : memref<5x1x128xf32, #tpu.memory_space<vmem>>, vector<1x1x128xf32>
    %16 = vector.shape_cast %15 : vector<1x1x128xf32> to vector<1x128xf32>
    %17 = vector.broadcast %16 : vector<1x128xf32> to vector<8x128xf32>
    %18 = arith.addf %14, %17 : vector<8x128xf32>
    %cst_14 = arith.constant 0.000000e+00 : f32
    %19 = vector.broadcast %cst_14 : f32 to vector<8x128xf32>
    %20 = arith.maximumf %18, %19 : vector<8x128xf32>
    %21 = arith.truncf %20 : vector<8x128xf32> to vector<8x128xbf16>
    %c2 = arith.constant 2 : index
    %c0_15 = arith.constant 0 : index
    %c0_16 = arith.constant 0 : index
    %22 = vector.load %arg1[%c2, %c0_15, %c0_16] : memref<5x128x128xbf16, #tpu.memory_space<vmem>>, vector<1x128x128xbf16>
    %23 = vector.shape_cast %22 : vector<1x128x128xbf16> to vector<128x128xbf16>
    %cst_17 = arith.constant dense<0.000000e+00> : vector<8x128xf32>
    %24 = tpu.matmul %21, %23, %cst_17 {dimension_numbers = #tpu.dot_dimension_numbers<[1], [0], [0], [1], [0, 0, 1, 1], [], []>} : vector<8x128xbf16>, vector<128x128xbf16>, vector<8x128xf32> -> vector<8x128xf32>
    %c2_18 = arith.constant 2 : index
    %c0_19 = arith.constant 0 : index
    %c0_20 = arith.constant 0 : index
    %25 = vector.load %arg2[%c2_18, %c0_19, %c0_20] : memref<5x1x128xf32, #tpu.memory_space<vmem>>, vector<1x1x128xf32>
    %26 = vector.shape_cast %25 : vector<1x1x128xf32> to vector<1x128xf32>
    %27 = vector.broadcast %26 : vector<1x128xf32> to vector<8x128xf32>
    %28 = arith.addf %24, %27 : vector<8x128xf32>
    %cst_21 = arith.constant 0.000000e+00 : f32
    %29 = vector.broadcast %cst_21 : f32 to vector<8x128xf32>
    %30 = arith.maximumf %28, %29 : vector<8x128xf32>
    %31 = arith.truncf %30 : vector<8x128xf32> to vector<8x128xbf16>
    %c3 = arith.constant 3 : index
    %c0_22 = arith.constant 0 : index
    %c0_23 = arith.constant 0 : index
    %32 = vector.load %arg1[%c3, %c0_22, %c0_23] : memref<5x128x128xbf16, #tpu.memory_space<vmem>>, vector<1x128x128xbf16>
    %33 = vector.shape_cast %32 : vector<1x128x128xbf16> to vector<128x128xbf16>
    %cst_24 = arith.constant dense<0.000000e+00> : vector<8x128xf32>
    %34 = tpu.matmul %31, %33, %cst_24 {dimension_numbers = #tpu.dot_dimension_numbers<[1], [0], [0], [1], [0, 0, 1, 1], [], []>} : vector<8x128xbf16>, vector<128x128xbf16>, vector<8x128xf32> -> vector<8x128xf32>
    %c3_25 = arith.constant 3 : index
    %c0_26 = arith.constant 0 : index
    %c0_27 = arith.constant 0 : index
    %35 = vector.load %arg2[%c3_25, %c0_26, %c0_27] : memref<5x1x128xf32, #tpu.memory_space<vmem>>, vector<1x1x128xf32>
    %36 = vector.shape_cast %35 : vector<1x1x128xf32> to vector<1x128xf32>
    %37 = vector.broadcast %36 : vector<1x128xf32> to vector<8x128xf32>
    %38 = arith.addf %34, %37 : vector<8x128xf32>
    %cst_28 = arith.constant 0.000000e+00 : f32
    %39 = vector.broadcast %cst_28 : f32 to vector<8x128xf32>
    %40 = arith.maximumf %38, %39 : vector<8x128xf32>
    %41 = arith.truncf %40 : vector<8x128xf32> to vector<8x128xbf16>
    %c4 = arith.constant 4 : index
    %c0_29 = arith.constant 0 : index
    %c0_30 = arith.constant 0 : index
    %42 = vector.load %arg1[%c4, %c0_29, %c0_30] : memref<5x128x128xbf16, #tpu.memory_space<vmem>>, vector<1x128x128xbf16>
    %43 = vector.shape_cast %42 : vector<1x128x128xbf16> to vector<128x128xbf16>
    %cst_31 = arith.constant dense<0.000000e+00> : vector<8x128xf32>
    %44 = tpu.matmul %41, %43, %cst_31 {dimension_numbers = #tpu.dot_dimension_numbers<[1], [0], [0], [1], [0, 0, 1, 1], [], []>} : vector<8x128xbf16>, vector<128x128xbf16>, vector<8x128xf32> -> vector<8x128xf32>
    %c4_32 = arith.constant 4 : index
    %c0_33 = arith.constant 0 : index
    %c0_34 = arith.constant 0 : index
    %45 = vector.load %arg2[%c4_32, %c0_33, %c0_34] : memref<5x1x128xf32, #tpu.memory_space<vmem>>, vector<1x1x128xf32>
    %46 = vector.shape_cast %45 : vector<1x1x128xf32> to vector<1x128xf32>
    %47 = vector.broadcast %46 : vector<1x128xf32> to vector<8x128xf32>
    %48 = arith.addf %44, %47 : vector<8x128xf32>
    %c0_35 = arith.constant 0 : index
    %c0_36 = arith.constant 0 : index
    %49 = vector.load %arg3[%c0_35, %c0_36] : memref<8x128xf32, #tpu.memory_space<vmem>>, vector<8x128xf32>
    tpu.vector_store %arg3[%c0_35, %c0_36], %48 {strides = array<i32>} : memref<8x128xf32, #tpu.memory_space<vmem>>, vector<8x128xf32>,
    return
  }
}

</mosaic_0001>

<bundles_post_ra>
// kernel: pokenet_forward.1
= control target key start
LH: loop header
LB: loop body
LE: loop exit
PB: predicated region body
PF: predicated region fallthrough
CT: control target
= control target key end

     0   :  { %8 = vsyncpa [#allocation3], 0  ;;  %s1025_s0 = inlined_call_operand.vmem [shape: f32[8,128], index: 0, kind: input, shape index: {}]   ;;  %s1026_s1 = inlined_call_operand.hbm [shape: bf16[5,128,128], index: 1, kind: input, shape index: {}]   ;;  %s1027_s2 = inlined_call_operand.vmem [shape: f32[5,1,128], index: 2, kind: input, shape index: {}]   ;;  %s1028_s3 = inlined_call_operand.hbm [shape: f32[8,128], index: 3, kind: output, shape index: {}]  }
   0x1   :  { %9 = vsyncpa [#allocation4], 0  ;;  %s907_s12 = smov [#allocation2]   ;;  %s859_s16 = scalar_lea.hbm %s1026_s1, 5120 }
   0x2   :  { %s17_s13 = sshll.u32 %s907_s12, 4  ;;  %p860_p0 = scmp.ne.s32.totalorder %s1026_s1, %s859_s16  ;;  %s18_s13 = int_to_ptr.vmem [resolvable:$true] %s17_s13 }
   0x3   :  { %p863_p1 = scmp.lt.u32.totalorder %s859_s16, %s1026_s1 }
   0x5   :  { %p865_p2 = pnand %p863_p1, %p860_p0 }
   0x7   :  { %868 = shalt.err (!%p865_p2)
}
   0x8   :  { %s869_s21 = scalar_lea.vmem %s18_s13, 5120  ;;  %p874_p4 = scmp.lt.s32.totalorder %s18_s13, %s18_s13 }
   0x9   :  { %p870_p3 = scmp.ne.s32.totalorder %s18_s13, %s869_s21  ;;  %p875_p5 = scmp.lt.s32.totalorder %s869_s21, %s869_s21 }
   0xb   :  { %p876_p6 = por %p875_p5, %p874_p4 }
   0xd   :  { %p877_p7 = pnand %p876_p6, %p870_p3 }
   0xf   :  { %880 = shalt.err (!%p877_p7)
}
  0x10   :  { %s908_s22 = smov 64   ;;  %s909_s23 = smov 4  }
  0x11   :  { %23 = dma.hbm_to_vmem [thread:$0]  %s1026_s1, 5120, %s18_s13, [#allocation3], %s908_s22, %s908_s22, %s909_s23  }
  0x12   :  { %903 = dma.done.wait [#allocation3], 5120  }
  0x13   :  { %904 = vsyncadd [#allocation3], 4294962176  ;;  %v910_v0 = vmov 0.0   ;;  %vm911_vm0 = vmmov 0   ;;  %v819_v1 = vld [vmem:[#allocation2] sm:$0xff]   ;;  %v820_v2 = vld [vmem:[#allocation2 + $0x8] sm:$0xff]  }
  0x14   :  { %713 = vmatprep.subr.bf16.mxu0 %v910_v0  ;;  %729 = vmatprep.mubr.msk.bf16.mxu0 %vm911_vm0, %v910_v0  ;;  %v821_v3 = vld [vmem:[#allocation2 + $0x10] sm:$0xff]   ;;  %v827_v4 = vld [vmem:[#allocation2 + $0x40] sm:$0xff]   ;;  %v822_v5 = vld [vmem:[#allocation2 + $0x18] sm:$0xff]   ;;  %s912_s9 = smov [#allocation5]  }
  0x15   :  { %733 = vmatprep.subr.bf16.mxu1 %v910_v0  ;;  %749 = vmatprep.mubr.msk.bf16.mxu1 %vm911_vm0, %v910_v0  ;;  %v828_v6 = vld [vmem:[#allocation2 + $0x48] sm:$0xff]   ;;  %v823_v7 = vld [vmem:[#allocation2 + $0x20] sm:$0xff]   ;;  %v829_v8 = vld [vmem:[#allocation2 + $0x50] sm:$0xff]   ;;  %s610_s10 = sshll.u32 %s912_s9, 4  ;;  %s611_s10 = int_to_ptr.vmem [resolvable:$true] %s610_s10 }
  0x16   :  { %714 = vmatpush3.bf16.msra.mxu0 %v819_v1  ;;  %734 = vmatpush3.bf16.msra.mxu1 %v827_v4  ;;  %v824_v9 = vld [vmem:[#allocation2 + $0x28] sm:$0xff]   ;;  %v830_v10 = vld [vmem:[#allocation2 + $0x58] sm:$0xff]   ;;  %v825_v11 = vld [vmem:[#allocation2 + $0x30] sm:$0xff]   ;;  %s881_s11 = scalar_lea.vmem %s611_s10, 128  ;;  %p886_p9 = scmp.lt.s32.totalorder %s611_s10, %s611_s10 }
  0x17   :  { %715 = vmatprep.subr.bf16.mxu0 %v910_v0  ;;  %735 = vmatprep.subr.bf16.mxu1 %v910_v0  ;;  %v831_v12 = vld [vmem:[#allocation2 + $0x60] sm:$0xff]   ;;  %v826_v13 = vld [vmem:[#allocation2 + $0x38] sm:$0xff]   ;;  %v832_v15 = vld [vmem:[#allocation2 + $0x68] sm:$0xff]   ;;  %p882_p8 = scmp.ne.s32.totalorder %s611_s10, %s881_s11  ;;  %p887_p10 = scmp.lt.s32.totalorder %s881_s11, %s881_s11 }
  0x18   :  { %v30_v14 = vld [vmem:[%s1025_s0] sm:$0xff]  ;;  %v833_v17 = vld [vmem:[#allocation2 + $0x70] sm:$0xff]   ;;  %v834_v18 = vld [vmem:[#allocation2 + $0x78] sm:$0xff]  }
  0x19   :  { %v31_v16 = vpack.c.bf16 %v30_v14, %v30_v14  ;;  %v835_v19 = vld [vmem:[#allocation2 + $0x80] sm:$0xff]   ;;  %v836_v20 = vld [vmem:[#allocation2 + $0x88] sm:$0xff]   ;;  %v837_v21 = vld [vmem:[#allocation2 + $0x90] sm:$0xff]   ;;  %p888_p11 = por %p887_p10, %p886_p9 }
  0x1a   :  { %716 = vmatpush3.bf16.msra.mxu0 %v820_v2  ;;  %736 = vmatpush3.bf16.msra.mxu1 %v828_v6  ;;  %v838_v22 = vld [vmem:[#allocation2 + $0x98] sm:$0xff]   ;;  %v839_v23 = vld [vmem:[#allocation2 + $0xa0] sm:$0xff]   ;;  %v840_v24 = vld [vmem:[#allocation2 + $0xa8] sm:$0xff]  }
  0x1b   :  { %717 = vmatprep.subr.bf16.mxu0 %v910_v0  ;;  %737 = vmatprep.subr.bf16.mxu1 %v910_v0  ;;  %v619_v25 = vld [vmem:[%s1027_s2] ss:$0 sm:$0xff]  ;;  %v841_v33 = vld [vmem:[#allocation2 + $0xb0] sm:$0xff]   ;;  %v842_v34 = vld [vmem:[#allocation2 + $0xb8] sm:$0xff]   ;;  %p889_p12 = pnand %p888_p11, %p882_p8 }
  0x1c   :  { %v843_v35 = vld [vmem:[#allocation2 + $0xc0] sm:$0xff]   ;;  %v844_v36 = vld [vmem:[#allocation2 + $0xc8] sm:$0xff]   ;;  %v845_v37 = vld [vmem:[#allocation2 + $0xd0] sm:$0xff]  }
  0x1d   :  { %v846_v38 = vld [vmem:[#allocation2 + $0xd8] sm:$0xff]   ;;  %v847_v39 = vld [vmem:[#allocation2 + $0xe0] sm:$0xff]   ;;  %v848_v40 = vld [vmem:[#allocation2 + $0xe8] sm:$0xff]  }
  0x1e   :  { %718 = vmatpush3.bf16.msra.mxu0 %v821_v3  ;;  %738 = vmatpush3.bf16.msra.mxu1 %v829_v8  ;;  %v629_v41 = vld [vmem:[%s1027_s2 + $0x1] ss:$0 sm:$0xff]  ;;  %v849_v49 = vld [vmem:[#allocation2 + $0xf0] sm:$0xff]   ;;  %v850_v50 = vld [vmem:[#allocation2 + $0xf8] sm:$0xff]  }
  0x1f   :  { %719 = vmatprep.subr.bf16.mxu0 %v910_v0  ;;  %739 = vmatprep.subr.bf16.mxu1 %v910_v0  ;;  %v851_v51 = vld [vmem:[#allocation2 + $0x100] sm:$0xff]   ;;  %v852_v52 = vld [vmem:[#allocation2 + $0x108] sm:$0xff]   ;;  %v853_v53 = vld [vmem:[#allocation2 + $0x110] sm:$0xff]  }
  0x20   :  { %v854_v54 = vld [vmem:[#allocation2 + $0x118] sm:$0xff]   ;;  %v855_v55 = vld [vmem:[#allocation2 + $0x120] sm:$0xff]   ;;  %v856_v56 = vld [vmem:[#allocation2 + $0x128] sm:$0xff]  }
  0x21   :  { %v639_v57 = vld [vmem:[%s1027_s2 + $0x2] ss:$0 sm:$0xff]  ;;  %v857_v2 = vld [vmem:[#allocation2 + $0x130] sm:$0xff]   ;;  %v858_v3 = vld [vmem:[#allocation2 + $0x138] sm:$0xff]  }
  0x22   :  { %720 = vmatpush3.bf16.msra.mxu0 %v822_v5  ;;  %740 = vmatpush3.bf16.msra.mxu1 %v830_v10  ;;  %v649_v4 = vld [vmem:[%s1027_s2 + $0x3] ss:$0 sm:$0xff] }
  0x23   :  { %721 = vmatprep.subr.bf16.mxu0 %v910_v0  ;;  %741 = vmatprep.subr.bf16.mxu1 %v910_v0 }
  0x26   :  { %722 = vmatpush3.bf16.msra.mxu0 %v823_v7  ;;  %742 = vmatpush3.bf16.msra.mxu1 %v831_v12  ;;  %v659_v12 = vld [vmem:[%s1027_s2 + $0x4] ss:$0 sm:$0xff] }
  0x27   :  { %723 = vmatprep.subr.bf16.mxu0 %v910_v0  ;;  %743 = vmatprep.subr.bf16.mxu1 %v910_v0 }
  0x2a   :  { %724 = vmatpush3.bf16.msra.mxu0 %v824_v9  ;;  %744 = vmatpush3.bf16.msra.mxu1 %v832_v15 }
  0x2b   :  { %725 = vmatprep.subr.bf16.mxu0 %v910_v0  ;;  %745 = vmatprep.subr.bf16.mxu1 %v910_v0 }
  0x2e   :  { %726 = vmatpush3.bf16.msra.mxu0 %v825_v11  ;;  %746 = vmatpush3.bf16.msra.mxu1 %v833_v17 }
  0x2f   :  { %727 = vmatprep.subr.bf16.mxu0 %v910_v0  ;;  %747 = vmatprep.subr.bf16.mxu1 %v910_v0 }
  0x32   :  { %728 = vmatpush3.bf16.msra.mxu0 %v826_v13  ;;  %748 = vmatpush3.bf16.msra.mxu1 %v834_v18 }
  0x33   :  { %753 = vmatprep.subr.bf16.mxu0 %v910_v0  ;;  %773 = vmatprep.subr.bf16.mxu1 %v910_v0 }
  0x35   :  { %730 = vmatmul.mubr.bf16.vlgmr.msra.gmra.mrb[0].mxu0 %v31_v16 }
  0x36   :  { %769 = vmatprep.mubr.msk.bf16.mxu0 %vm911_vm0, %v910_v0  ;;  %754 = vmatpush3.bf16.msra.mxu0 %v835_v19 }
  0x37   :  { %755 = vmatprep.subr.bf16.mxu0 %v910_v0 }
  0x3a   :  { %756 = vmatpush3.bf16.msra.mxu0 %v836_v20 }
  0x3b   :  { %757 = vmatprep.subr.bf16.mxu0 %v910_v0 }
  0x3e   :  { %758 = vmatpush3.bf16.msra.mxu0 %v837_v21 }
  0x3f   :  { %759 = vmatprep.subr.bf16.mxu0 %v910_v0 }
  0x42   :  { %760 = vmatpush3.bf16.msra.mxu0 %v838_v22 }
  0x43   :  { %761 = vmatprep.subr.bf16.mxu0 %v910_v0 }
  0x46   :  { %762 = vmatpush3.bf16.msra.mxu0 %v839_v23 }
  0x47   :  { %763 = vmatprep.subr.bf16.mxu0 %v910_v0 }
  0x4a   :  { %764 = vmatpush3.bf16.msra.mxu0 %v840_v24 }
  0x4b   :  { %765 = vmatprep.subr.bf16.mxu0 %v910_v0 }
  0x4e   :  { %766 = vmatpush3.bf16.msra.mxu0 %v841_v33 }
  0x4f   :  { %767 = vmatprep.subr.bf16.mxu0 %v910_v0 }
  0x52   :  { %768 = vmatpush3.bf16.msra.mxu0 %v842_v34 }
  0x53   :  { %793 = vmatprep.subr.bf16.mxu0 %v910_v0 }
 0x108   :  { %v137_v26 = vpop.f32.mrb[0].mxu0 }
 0x109   :  { %v138_v27 = vadd.f32 %v619_v25, %v137_v26  ;;  %v731_v28 = vpop.f32.mrb[1].mxu0 }
 0x10a   :  { %v140_v29 = vpop.f32.mrb[2].mxu0 }
 0x10b   :  { %v143_v30 = vmax.f32 %v138_v27, 0.0  ;;  %v732_v31 = vpop.f32.mrb[3].mxu0 }
 0x10d   :  { %v144_v32 = vpack.c.bf16 %v143_v30, %v143_v30 }
 0x10f   :  { %750 = vmatmul.mubr.bf16.vlgmr.msra.gmra.mrb[0].mxu1 %v144_v32 }
 0x110   :  { %789 = vmatprep.mubr.msk.bf16.mxu1 %vm911_vm0, %v910_v0  ;;  %774 = vmatpush3.bf16.msra.mxu1 %v843_v35 }
 0x111   :  { %775 = vmatprep.subr.bf16.mxu1 %v910_v0 }
 0x114   :  { %776 = vmatpush3.bf16.msra.mxu1 %v844_v36 }
 0x115   :  { %777 = vmatprep.subr.bf16.mxu1 %v910_v0 }
 0x118   :  { %778 = vmatpush3.bf16.msra.mxu1 %v845_v37 }
 0x119   :  { %779 = vmatprep.subr.bf16.mxu1 %v910_v0 }
 0x11c   :  { %780 = vmatpush3.bf16.msra.mxu1 %v846_v38 }
 0x11d   :  { %781 = vmatprep.subr.bf16.mxu1 %v910_v0 }
 0x120   :  { %782 = vmatpush3.bf16.msra.mxu1 %v847_v39 }
 0x121   :  { %783 = vmatprep.subr.bf16.mxu1 %v910_v0 }
 0x124   :  { %784 = vmatpush3.bf16.msra.mxu1 %v848_v40 }
 0x125   :  { %785 = vmatprep.subr.bf16.mxu1 %v910_v0 }
 0x128   :  { %786 = vmatpush3.bf16.msra.mxu1 %v849_v49 }
 0x129   :  { %787 = vmatprep.subr.bf16.mxu1 %v910_v0 }
 0x12c   :  { %788 = vmatpush3.bf16.msra.mxu1 %v850_v50 }
 0x1e2   :  { %v252_v42 = vpop.f32.mrb[0].mxu1 }
 0x1e3   :  { %v253_v43 = vadd.f32 %v629_v41, %v252_v42  ;;  %v751_v44 = vpop.f32.mrb[1].mxu1 }
 0x1e4   :  { %v255_v45 = vpop.f32.mrb[2].mxu1 }
 0x1e5   :  { %v258_v46 = vmax.f32 %v253_v43, 0.0  ;;  %v752_v47 = vpop.f32.mrb[3].mxu1 }
 0x1e7   :  { %v259_v48 = vpack.c.bf16 %v258_v46, %v258_v46 }
 0x1e9   :  { %770 = vmatmul.mubr.bf16.vlgmr.msra.gmra.mrb[4].mxu0 %v259_v48 }
 0x1ea   :  { %809 = vmatprep.mubr.msk.bf16.mxu0 %vm911_vm0, %v910_v0  ;;  %794 = vmatpush3.bf16.msra.mxu0 %v851_v51 }
 0x1eb   :  { %795 = vmatprep.subr.bf16.mxu0 %v910_v0 }
 0x1ee   :  { %796 = vmatpush3.bf16.msra.mxu0 %v852_v52 }
 0x1ef   :  { %797 = vmatprep.subr.bf16.mxu0 %v910_v0 }
 0x1f2   :  { %798 = vmatpush3.bf16.msra.mxu0 %v853_v53 }
 0x1f3   :  { %799 = vmatprep.subr.bf16.mxu0 %v910_v0 }
 0x1f6   :  { %800 = vmatpush3.bf16.msra.mxu0 %v854_v54 }
 0x1f7   :  { %801 = vmatprep.subr.bf16.mxu0 %v910_v0 }
 0x1fa   :  { %802 = vmatpush3.bf16.msra.mxu0 %v855_v55 }
 0x1fb   :  { %803 = vmatprep.subr.bf16.mxu0 %v910_v0 }
 0x1fe   :  { %804 = vmatpush3.bf16.msra.mxu0 %v856_v56 }
 0x1ff   :  { %805 = vmatprep.subr.bf16.mxu0 %v910_v0 }
 0x202   :  { %806 = vmatpush3.bf16.msra.mxu0 %v857_v2 }
 0x203   :  { %807 = vmatprep.subr.bf16.mxu0 %v910_v0 }
 0x206   :  { %808 = vmatpush3.bf16.msra.mxu0 %v858_v3 }
 0x2bc   :  { %v367_v58 = vpop.f32.mrb[4].mxu0 }
 0x2bd   :  { %v368_v59 = vadd.f32 %v639_v57, %v367_v58  ;;  %v771_v60 = vpop.f32.mrb[5].mxu0 }
 0x2be   :  { %v370_v61 = vpop.f32.mrb[6].mxu0 }
 0x2bf   :  { %v373_v62 = vmax.f32 %v368_v59, 0.0  ;;  %v772_v63 = vpop.f32.mrb[7].mxu0 }
 0x2c1   :  { %v374_v1 = vpack.c.bf16 %v373_v62, %v373_v62 }
 0x2c3   :  { %790 = vmatmul.mubr.bf16.vlgmr.msra.gmra.mrb[4].mxu1 %v374_v1 }
 0x396   :  { %v482_v5 = vpop.f32.mrb[4].mxu1 }
 0x397   :  { %v483_v6 = vadd.f32 %v649_v4, %v482_v5  ;;  %v791_v7 = vpop.f32.mrb[5].mxu1 }
 0x398   :  { %v485_v8 = vpop.f32.mrb[6].mxu1 }
 0x399   :  { %v488_v9 = vmax.f32 %v483_v6, 0.0  ;;  %v792_v10 = vpop.f32.mrb[7].mxu1 }
 0x39b   :  { %v489_v11 = vpack.c.bf16 %v488_v9, %v488_v9 }
 0x39d   :  { %810 = vmatmul.mubr.bf16.vlgmr.msra.gmra.mrb[8].mxu0 %v489_v11 }
 0x470   :  { %v597_v0 = vpop.f32.mrb[8].mxu0 }
 0x471   :  { %v598_v13 = vadd.f32 %v659_v12, %v597_v0  ;;  %v811_v14 = vpop.f32.mrb[9].mxu0 }
 0x472   :  { %v600_v15 = vpop.f32.mrb[10].mxu0 }
 0x473   :  { %603 = vst [vmem:[#allocation5] sm:$0xff] %v598_v13  ;;  %v812_v16 = vpop.f32.mrb[11].mxu0 }
 0x474   :  { %892 = shalt.err (!%p889_p12)
}
 0x475   :  { %s893_s2 = scalar_lea.hbm %s1028_s3, 128 }
 0x476   :  { %p894_p13 = scmp.ne.s32.totalorder %s1028_s3, %s893_s2  ;;  %p897_p0 = scmp.lt.u32.totalorder %s893_s2, %s1028_s3 }
 0x478   :  { %p899_p1 = pnand %p897_p0, %p894_p13 }
 0x47a   :  { %902 = shalt.err (!%p899_p1)
}
 0x47b   :  { %613 = dma.vmem_to_hbm [thread:$0]  %s611_s10, 128, %s1028_s3, [#allocation4]  }
 0x47c   :  { %905 = dma.done.wait [#allocation4], 128  }
 0x47d   :  { %906 = vsyncadd [#allocation4], 4294967168 }
 0x47e   :  { %617 = vsyncpa [#allocation3], 1 }
 0x47f   :  { %618 = vsyncpa [#allocation4], 1 }

</bundles_post_ra>
